<compile_context>
chip_gen: v5e
topology: v5e:2x2
jax: 0.10.0
libtpu: 0.0.40
codegen_flags: <defaults>
</compile_context>

<pallas_src>
import functools

import jax
import jax.numpy as jnp
from jax import lax
from jax.experimental import pallas as pl
from jax.experimental.pallas import tpu as pltpu


def _eps_greedy_kernel(num_actions, eps_ref, u_ref, ra_ref,
                       s_ref, w_ref, keys_ref, out_ref,
                       vmax_sc, kmax_sc, idx_sc):
    """One grid step handles a (tile_a, D) tile of the weight matrix.

    eps_ref/u_ref/ra_ref : (1,) SMEM scalars (epsilon, uniform draw, random action)
    s_ref   : (1, D)        VMEM  state row (compute dtype)
    w_ref   : (tile_a, D)   VMEM  weight tile (rows = actions)
    keys_ref: (1, tile_a)   VMEM  per-action random tie-break keys (i32)
    out_ref : (1, 1)        VMEM  selected action (i32)
    *_sc    : (1, 1)        VMEM  running argmax carry (value / key / index)
    """
    i = pl.program_id(0)
    tile_a = w_ref.shape[0]

    # ---- value function on the MXU, lane-dense (1, tile_a) result -------
    # vals[0, a] = sum_d state[d] * W[a, d]
    vals = lax.dot_general(
        s_ref[...], w_ref[...],
        dimension_numbers=(((1,), (1,)), ((), ())),
        preferred_element_type=jnp.float32,
    )

    # mask out padded / ragged actions (global index >= num_actions)
    lane = lax.broadcasted_iota(jnp.int32, (1, tile_a), 1)
    gidx = i * tile_a + lane
    valid = gidx < num_actions
    vals = jnp.where(valid, vals, float("-inf"))   # also discards NaN garbage
    keys = jnp.where(valid, keys_ref[...], -1)

    # ---- tile-local argmax with uniform random tie-breaking --------------
    t_vmax = jnp.max(vals, axis=1, keepdims=True)                       # (1, 1)
    t_key = jnp.where(vals == t_vmax, keys, -1)                         # (1, tile_a)
    t_kmax = jnp.max(t_key, axis=1, keepdims=True)                      # (1, 1)
    t_idx = jnp.min(jnp.where(t_key == t_kmax, gidx, 2**31 - 1),
                    axis=1, keepdims=True)                              # (1, 1)

    @pl.when(i == 0)
    def _init():
        vmax_sc[...] = jnp.full((1, 1), float("-inf"), jnp.float32)
        kmax_sc[...] = jnp.full((1, 1), -1, jnp.int32)
        idx_sc[...] = jnp.zeros((1, 1), jnp.int32)

    # ---- fold the tile result into the running carry ---------------------
    better = (t_vmax > vmax_sc[...]) | (
        (t_vmax == vmax_sc[...]) & (t_kmax > kmax_sc[...]))
    vmax_sc[...] = jnp.where(better, t_vmax, vmax_sc[...])
    kmax_sc[...] = jnp.where(better, t_kmax, kmax_sc[...])
    idx_sc[...] = jnp.where(better, t_idx, idx_sc[...])

    # ---- epsilon branch + final store -------------------------------------
    @pl.when(i == pl.num_programs(0) - 1)
    def _finalize():
        explore = u_ref[0] <= eps_ref[0]                 # U(0,1) > eps -> greedy
        rand_act = jnp.full((1, 1), ra_ref[0], jnp.int32)
        out_ref[...] = jnp.where(explore, rand_act, idx_sc[...]).astype(jnp.int32)


def epsilon_greedy_action(weights, state, eps, key, *, tile_a=None,
                          weights_dtype=jnp.bfloat16,
                          vmem_budget_bytes=16 << 20):
    """weights: reshapeable to (num_actions, state_dim), state: (state_dim,),
       eps: float, key: jax PRNG key  ->  int32 action.

    weights_dtype: dtype the W stream is cast to before the kernel
      (bf16 default; None keeps the input dtype; jnp.float8_e4m3fn on v7x).
    In an RL loop this wrapper should be jitted (and the cast/pre-tiled
    weights hoisted/cached) so the random draws and casts fuse around the
    single pallas_call.
    """
    state = jnp.asarray(state)
    weights = jnp.asarray(weights).reshape(-1, state.size)   # model.view(-1, numel)
    if weights_dtype is not None:
        weights = weights.astype(weights_dtype)

    num_actions, state_dim = weights.shape
    compute_dtype = weights.dtype
    itemsize = jnp.dtype(compute_dtype).itemsize
    s_row = state.reshape(1, state_dim).astype(compute_dtype)   # hoisted cast

    # ---- action-tile sizing: multiple of 128, fits the double-buffer budget
    a_ceil = pl.cdiv(num_actions, 128) * 128
    budget_rows = max(128, (vmem_budget_bytes // (2 * state_dim * itemsize))
                      // 128 * 128)
    if tile_a is None:
        tile_a = min(budget_rows, a_ceil)          # single grid step when it fits
    else:
        tile_a = max(128, pl.cdiv(int(tile_a), 128) * 128)
        tile_a = min(tile_a, a_ceil)
    n_tiles = pl.cdiv(num_actions, tile_a)
    a_pad = n_tiles * tile_a                       # keys only (4 B/action, cheap)

    # ---- host-side randomness (no in-kernel PRNG needed) -------------------
    k_keys, k_u, k_act = jax.random.split(key, 3)
    tie_keys = jax.random.randint(k_keys, (1, a_pad), 0, 2**31 - 1, jnp.int32)
    u = jax.random.uniform(k_u, (1,), jnp.float32)
    rand_act = jax.random.randint(k_act, (1,), 0, num_actions, jnp.int32)
    eps_arr = jnp.asarray([eps], jnp.float32)

    kernel = functools.partial(_eps_greedy_kernel, num_actions)

    bytes_accessed = (num_actions * state_dim * itemsize      # W stream
                      + state_dim * itemsize                  # state
                      + a_pad * 4 + 16)                       # keys + scalars
    cost = pl.CostEstimate(flops=2 * num_actions * state_dim,
                           transcendentals=0,
                           bytes_accessed=bytes_accessed)

    action = pl.pallas_call(
        kernel,
        out_shape=jax.ShapeDtypeStruct((1, 1), jnp.int32),
        grid_spec=pltpu.PrefetchScalarGridSpec(
            num_scalar_prefetch=0,
            grid=(n_tiles,),
            in_specs=[
                pl.BlockSpec(memory_space=pltpu.MemorySpace.SMEM),   # eps
                pl.BlockSpec(memory_space=pltpu.MemorySpace.SMEM),   # uniform draw
                pl.BlockSpec(memory_space=pltpu.MemorySpace.SMEM),   # random action
                pl.BlockSpec((1, state_dim), lambda i: (0, 0)),      # state row
                pl.BlockSpec((tile_a, state_dim), lambda i: (i, 0)),  # W tile
                pl.BlockSpec((1, tile_a), lambda i: (0, i)),         # tie keys
            ],
            out_specs=pl.BlockSpec((1, 1), lambda i: (0, 0)),
            scratch_shapes=[
                pltpu.VMEM((1, 1), jnp.float32),   # running best value
                pltpu.VMEM((1, 1), jnp.int32),     # running best key
                pltpu.VMEM((1, 1), jnp.int32),     # running best index
            ],
        ),
        compiler_params=pltpu.CompilerParams(
            dimension_semantics=("arbitrary",),    # reduction over action tiles
            vmem_limit_bytes=32 << 20),            # > v5e's 16 MiB default, < v7x phys
        cost_estimate=cost,
    )(eps_arr, u, rand_act, s_row, weights, tie_keys)

    return action[0, 0]


if __name__ == "__main__":
    root = jax.random.PRNGKey(0)
    kw, ks, k1, k2, k3 = jax.random.split(root, 5)

    # Small linear value-function "model": num_actions=8, state_dim=128.
    num_actions, state_dim = 8, 128
    weights = jax.random.normal(kw, (num_actions, state_dim), jnp.float32)
    state = jax.random.normal(ks, (state_dim,), jnp.float32)

    # eps = 0.0 -> greedy (exact f32 path): action must attain ~max value.
    act_greedy = jax.block_until_ready(
        epsilon_greedy_action(weights, state, eps=0.0, key=k1,
                              weights_dtype=None))
    values_ref = weights @ state
    spread0 = float(values_ref.max() - values_ref.min()) + 1e-6
    assert 0 <= int(act_greedy) < num_actions, "greedy action out of range"
    assert float(values_ref[int(act_greedy)]) >= float(values_ref.max()) - 1e-4 * spread0, \
        "greedy action not at the maximum value"

    # eps = 1.0 -> random branch: action must be a valid action index.
    act_random = jax.block_until_ready(
        epsilon_greedy_action(weights, state, eps=1.0, key=k2))
    assert 0 <= int(act_random) < num_actions, "random action out of range"

    # Larger action set: exercises the multi-tile carry path + default bf16 stream.
    a2, d2 = 384, 256
    kw2, ks2 = jax.random.split(k3)
    w2 = jax.random.normal(kw2, (a2, d2), jnp.float32)
    s2 = jax.random.normal(ks2, (d2,), jnp.float32)
    act2 = jax.block_until_ready(
        epsilon_greedy_action(w2, s2, eps=0.0, key=jax.random.PRNGKey(7),
                              tile_a=128))   # force 3 grid steps
    v2_ref = (w2.astype(jnp.bfloat16).astype(jnp.float32)
              ) @ (s2.astype(jnp.bfloat16).astype(jnp.float32))
    spread = float(v2_ref.max() - v2_ref.min()) + 1e-6
    assert 0 <= int(act2) < a2, "large-A action out of range"
    assert float(v2_ref[int(act2)]) >= float(v2_ref.max()) - 0.05 * spread, \
        "large-A greedy action not near the maximum value"

    print("KERNEL_OK")
</pallas_src>

<mosaic_0001>
module attributes {stable_mosaic.version = 11 : i64} {
  func.func @_eps_greedy_kernel(%arg0: i32, %arg1: memref<1xf32, #tpu.memory_space<smem>>, %arg2: memref<1xf32, #tpu.memory_space<smem>>, %arg3: memref<1xi32, #tpu.memory_space<smem>>, %arg4: memref<1x128xf32, #tpu.memory_space<vmem>>, %arg5: memref<128x128xf32, #tpu.memory_space<vmem>>, %arg6: memref<1x128xi32, #tpu.memory_space<vmem>>, %arg7: memref<1x1xi32, #tpu.memory_space<vmem>>, %arg8: memref<1x1xf32, #tpu.memory_space<vmem>>, %arg9: memref<1x1xi32, #tpu.memory_space<vmem>>, %arg10: memref<1x1xi32, #tpu.memory_space<vmem>>) attributes {dimension_semantics = [#tpu.dimension_semantics<arbitrary>], iteration_bounds = array<i64: 1>, scalar_prefetch = 0 : i64, scratch_operands = 3 : i64, tpu.core_type = #tpu.core_type<tc>, window_params = [{transform_indices = @transform_0, window_bounds = array<i64: 1>}, {transform_indices = @transform_1, window_bounds = array<i64: 1>}, {transform_indices = @transform_2, window_bounds = array<i64: 1>}, {pipeline_mode = #tpu.pipeline_mode<synchronous>, transform_indices = @transform_3, window_bounds = array<i64: 1, 128>}, {transform_indices = @transform_4, window_bounds = array<i64: 128, 128>}, {transform_indices = @transform_5, window_bounds = array<i64: 1, 128>}, {pipeline_mode = #tpu.pipeline_mode<synchronous>, transform_indices = @transform_6, window_bounds = array<i64: 1, 1>}]} {
    %c0 = arith.constant 0 : index
    %c0_0 = arith.constant 0 : index
    %0 = vector.load %arg4[%c0, %c0_0] : memref<1x128xf32, #tpu.memory_space<vmem>>, vector<1x128xf32>
    %c0_1 = arith.constant 0 : index
    %c0_2 = arith.constant 0 : index
    %1 = vector.load %arg5[%c0_1, %c0_2] : memref<128x128xf32, #tpu.memory_space<vmem>>, vector<128x128xf32>
    %cst = arith.constant dense<0.000000e+00> : vector<1x128xf32>
    %2 = tpu.matmul %0, %1, %cst {dimension_numbers = #tpu.dot_dimension_numbers<[1], [1], [0], [0], [0, 0, 1, 0], [], []>} : vector<1x128xf32>, vector<128x128xf32>, vector<1x128xf32> -> vector<1x128xf32>
    %3 = tpu.iota {dimensions = array<i32: 1>} : vector<1x128xi32>
    %c128_i32 = arith.constant 128 : i32
    %4 = arith.muli %arg0, %c128_i32 : i32
    %5 = vector.broadcast %4 : i32 to vector<1x128xi32>
    %6 = arith.addi %5, %3 : vector<1x128xi32>
    %c8_i32 = arith.constant 8 : i32
    %7 = vector.broadcast %c8_i32 : i32 to vector<1x128xi32>
    %8 = arith.cmpi slt, %6, %7 : vector<1x128xi32>
    %cst_3 = arith.constant 0xFF800000 : f32
    %9 = vector.broadcast %cst_3 : f32 to vector<1x128xf32>
    %10 = arith.select %8, %2, %9 : vector<1x128xi1>, vector<1x128xf32>
    %c0_4 = arith.constant 0 : index
    %c0_5 = arith.constant 0 : index
    %11 = vector.load %arg6[%c0_4, %c0_5] : memref<1x128xi32, #tpu.memory_space<vmem>>, vector<1x128xi32>
    %c-1_i32 = arith.constant -1 : i32
    %12 = vector.broadcast %c-1_i32 : i32 to vector<1x128xi32>
    %13 = arith.select %8, %11, %12 : vector<1x128xi1>, vector<1x128xi32>
    %cst_6 = arith.constant dense<0xFF800000> : vector<1xf32>
    %14 = vector.multi_reduction <maximumf>, %10, %cst_6 [1] : vector<1x128xf32> to vector<1xf32>
    %15 = vector.shape_cast %14 : vector<1xf32> to vector<1x1xf32>
    %16 = vector.broadcast %15 : vector<1x1xf32> to vector<1x128xf32>
    %17 = arith.cmpf oeq, %10, %16 : vector<1x128xf32>
    %c-1_i32_7 = arith.constant -1 : i32
    %18 = vector.broadcast %c-1_i32_7 : i32 to vector<1x128xi32>
    %19 = arith.select %17, %13, %18 : vector<1x128xi1>, vector<1x128xi32>
    %cst_8 = arith.constant dense<-2147483648> : vector<1xi32>
    %20 = vector.multi_reduction <maxsi>, %19, %cst_8 [1] : vector<1x128xi32> to vector<1xi32>
    %21 = vector.shape_cast %20 : vector<1xi32> to vector<1x1xi32>
    %22 = vector.broadcast %21 : vector<1x1xi32> to vector<1x128xi32>
    %23 = arith.cmpi eq, %19, %22 : vector<1x128xi32>
    %c2147483647_i32 = arith.constant 2147483647 : i32
    %24 = vector.broadcast %c2147483647_i32 : i32 to vector<1x128xi32>
    %25 = arith.select %23, %6, %24 : vector<1x128xi1>, vector<1x128xi32>
    %cst_9 = arith.constant dense<2147483647> : vector<1xi32>
    %26 = vector.multi_reduction <minsi>, %25, %cst_9 [1] : vector<1x128xi32> to vector<1xi32>
    %27 = vector.shape_cast %26 : vector<1xi32> to vector<1x1xi32>
    %c0_i32 = arith.constant 0 : i32
    %28 = arith.cmpi eq, %arg0, %c0_i32 : i32
    %29 = arith.extui %28 : i1 to i32
    %c0_i32_10 = arith.constant 0 : i32
    %30 = arith.cmpi ne, %29, %c0_i32_10 : i32
    scf.if %30 {
      %cst_31 = arith.constant 0xFF800000 : f32
      %51 = vector.broadcast %cst_31 : f32 to vector<1x1xf32>
      %c0_32 = arith.constant 0 : index
      %c0_33 = arith.constant 0 : index
      %52 = vector.load %arg8[%c0_32, %c0_33] : memref<1x1xf32, #tpu.memory_space<vmem>>, vector<1x1xf32>
      tpu.vector_store %arg8[%c0_32, %c0_33], %51 {strides = array<i32>} : memref<1x1xf32, #tpu.memory_space<vmem>>, vector<1x1xf32>,
      %c-1_i32_34 = arith.constant -1 : i32
      %53 = vector.broadcast %c-1_i32_34 : i32 to vector<1x1xi32>
      %c0_35 = arith.constant 0 : index
      %c0_36 = arith.constant 0 : index
      %54 = vector.load %arg9[%c0_35, %c0_36] : memref<1x1xi32, #tpu.memory_space<vmem>>, vector<1x1xi32>
      tpu.vector_store %arg9[%c0_35, %c0_36], %53 {strides = array<i32>} : memref<1x1xi32, #tpu.memory_space<vmem>>, vector<1x1xi32>,
      %c0_i32_37 = arith.constant 0 : i32
      %55 = vector.broadcast %c0_i32_37 : i32 to vector<1x1xi32>
      %c0_38 = arith.constant 0 : index
      %c0_39 = arith.constant 0 : index
      %56 = vector.load %arg10[%c0_38, %c0_39] : memref<1x1xi32, #tpu.memory_space<vmem>>, vector<1x1xi32>
      tpu.vector_store %arg10[%c0_38, %c0_39], %55 {strides = array<i32>} : memref<1x1xi32, #tpu.memory_space<vmem>>, vector<1x1xi32>,
    } else {
    }
    %c0_11 = arith.constant 0 : index
    %c0_12 = arith.constant 0 : index
    %31 = vector.load %arg8[%c0_11, %c0_12] : memref<1x1xf32, #tpu.memory_space<vmem>>, vector<1x1xf32>
    %32 = arith.cmpf ogt, %15, %31 : vector<1x1xf32>
    %c0_13 = arith.constant 0 : index
    %c0_14 = arith.constant 0 : index
    %33 = vector.load %arg8[%c0_13, %c0_14] : memref<1x1xf32, #tpu.memory_space<vmem>>, vector<1x1xf32>
    %34 = arith.cmpf oeq, %15, %33 : vector<1x1xf32>
    %c0_15 = arith.constant 0 : index
    %c0_16 = arith.constant 0 : index
    %35 = vector.load %arg9[%c0_15, %c0_16] : memref<1x1xi32, #tpu.memory_space<vmem>>, vector<1x1xi32>
    %36 = arith.cmpi sgt, %21, %35 : vector<1x1xi32>
    %37 = arith.andi %34, %36 : vector<1x1xi1>
    %38 = arith.ori %32, %37 : vector<1x1xi1>
    %c0_17 = arith.constant 0 : index
    %c0_18 = arith.constant 0 : index
    %39 = vector.load %arg8[%c0_17, %c0_18] : memref<1x1xf32, #tpu.memory_space<vmem>>, vector<1x1xf32>
    %40 = arith.select %38, %15, %39 : vector<1x1xi1>, vector<1x1xf32>
    %c0_19 = arith.constant 0 : index
    %c0_20 = arith.constant 0 : index
    %41 = vector.load %arg8[%c0_19, %c0_20] : memref<1x1xf32, #tpu.memory_space<vmem>>, vector<1x1xf32>
    tpu.vector_store %arg8[%c0_19, %c0_20], %40 {strides = array<i32>} : memref<1x1xf32, #tpu.memory_space<vmem>>, vector<1x1xf32>,
    %c0_21 = arith.constant 0 : index
    %c0_22 = arith.constant 0 : index
    %42 = vector.load %arg9[%c0_21, %c0_22] : memref<1x1xi32, #tpu.memory_space<vmem>>, vector<1x1xi32>
    %43 = arith.select %38, %21, %42 : vector<1x1xi1>, vector<1x1xi32>
    %c0_23 = arith.constant 0 : index
    %c0_24 = arith.constant 0 : index
    %44 = vector.load %arg9[%c0_23, %c0_24] : memref<1x1xi32, #tpu.memory_space<vmem>>, vector<1x1xi32>
    tpu.vector_store %arg9[%c0_23, %c0_24], %43 {strides = array<i32>} : memref<1x1xi32, #tpu.memory_space<vmem>>, vector<1x1xi32>,
    %c0_25 = arith.constant 0 : index
    %c0_26 = arith.constant 0 : index
    %45 = vector.load %arg10[%c0_25, %c0_26] : memref<1x1xi32, #tpu.memory_space<vmem>>, vector<1x1xi32>
    %46 = arith.select %38, %27, %45 : vector<1x1xi1>, vector<1x1xi32>
    %c0_27 = arith.constant 0 : index
    %c0_28 = arith.constant 0 : index
    %47 = vector.load %arg10[%c0_27, %c0_28] : memref<1x1xi32, #tpu.memory_space<vmem>>, vector<1x1xi32>
    tpu.vector_store %arg10[%c0_27, %c0_28], %46 {strides = array<i32>} : memref<1x1xi32, #tpu.memory_space<vmem>>, vector<1x1xi32>,
    %c0_i32_29 = arith.constant 0 : i32
    %48 = arith.cmpi eq, %arg0, %c0_i32_29 : i32
    %49 = arith.extui %48 : i1 to i32
    %c0_i32_30 = arith.constant 0 : i32
    %50 = arith.cmpi ne, %49, %c0_i32_30 : i32
    scf.if %50 {
      %c0_31 = arith.constant 0 : index
      %51 = memref.load %arg2[%c0_31] : memref<1xf32, #tpu.memory_space<smem>>
      %c0_32 = arith.constant 0 : index
      %52 = memref.load %arg1[%c0_32] : memref<1xf32, #tpu.memory_space<smem>>
      %53 = arith.cmpf ole, %51, %52 : f32
      %c0_33 = arith.constant 0 : index
      %54 = memref.load %arg3[%c0_33] : memref<1xi32, #tpu.memory_space<smem>>
      %55 = vector.broadcast %54 : i32 to vector<1x1xi32>
      %c0_34 = arith.constant 0 : index
      %c0_35 = arith.constant 0 : index
      %56 = vector.load %arg10[%c0_34, %c0_35] : memref<1x1xi32, #tpu.memory_space<vmem>>, vector<1x1xi32>
      %57 = arith.select %53, %55, %56 : vector<1x1xi32>
      %c0_36 = arith.constant 0 : index
      %c0_37 = arith.constant 0 : index
      %58 = vector.load %arg7[%c0_36, %c0_37] : memref<1x1xi32, #tpu.memory_space<vmem>>, vector<1x1xi32>
      tpu.vector_store %arg7[%c0_36, %c0_37], %57 {strides = array<i32>} : memref<1x1xi32, #tpu.memory_space<vmem>>, vector<1x1xi32>,
    } else {
    }
    return
  }
  func.func @transform_0(%arg0: i32) -> i32 {
    %c0_i32 = arith.constant 0 : i32
    %c0_i32_0 = arith.constant 0 : i32
    return %c0_i32 : i32
  }
  func.func @transform_1(%arg0: i32) -> i32 {
    %c0_i32 = arith.constant 0 : i32
    %c0_i32_0 = arith.constant 0 : i32
    return %c0_i32 : i32
  }
  func.func @transform_2(%arg0: i32) -> i32 {
    %c0_i32 = arith.constant 0 : i32
    %c0_i32_0 = arith.constant 0 : i32
    return %c0_i32 : i32
  }
  func.func @transform_3(%arg0: i32) -> (i32, i32) {
    %c0_i32 = arith.constant 0 : i32
    %c0_i32_0 = arith.constant 0 : i32
    %c0_i32_1 = arith.constant 0 : i32
    return %c0_i32, %c0_i32_0 : i32, i32
  }
  func.func @transform_4(%arg0: i32) -> (i32, i32) {
    %c0_i32 = arith.constant 0 : i32
    %c0_i32_0 = arith.constant 0 : i32
    return %arg0, %c0_i32 : i32, i32
  }
  func.func @transform_5(%arg0: i32) -> (i32, i32) {
    %c0_i32 = arith.constant 0 : i32
    %c0_i32_0 = arith.constant 0 : i32
    return %c0_i32, %arg0 : i32, i32
  }
  func.func @transform_6(%arg0: i32) -> (i32, i32) {
    %c0_i32 = arith.constant 0 : i32
    %c0_i32_0 = arith.constant 0 : i32
    %c0_i32_1 = arith.constant 0 : i32
    return %c0_i32, %c0_i32_0 : i32, i32
  }
}

</mosaic_0001>

<bundles_post_ra>
// kernel: tpu_custom_call.1
= control target key start
LH: loop header
LB: loop body
LE: loop exit
PB: predicated region body
PF: predicated region fallthrough
CT: control target
= control target key end

     0   :  { %14 = vsyncpa [#allocation9], 0  ;;  %s324_s0 = inlined_call_operand.<no memory space> [shape: f32[1], index: 0, kind: input, shape index: {}]   ;;  %s325_s1 = inlined_call_operand.<no memory space> [shape: f32[1], index: 1, kind: input, shape index: {}]   ;;  %s326_s2 = inlined_call_operand.<no memory space> [shape: s32[1], index: 2, kind: input, shape index: {}]   ;;  %s327_s3 = inlined_call_operand.vmem [shape: f32[1,128], index: 3, kind: input, shape index: {}]   ;;  %s328_s4 = inlined_call_operand.hbm [shape: f32[8,128], index: 4, kind: input, shape index: {}]   ;;  %s329_s5 = inlined_call_operand.vmem [shape: s32[1,128], index: 5, kind: input, shape index: {}]   ;;  %s330_s6 = inlined_call_operand.hbm [shape: s32[1,1], index: 6, kind: output, shape index: {}]  }
   0x1   :  { %15 = vsyncpa [#allocation10], 0 }
   0x2   :  { %27 = vsyncadd [#allocation9], 1920  ;;  %s28_s23 = sshll.u32 %s328_s4, 4  ;;  %s241_s24 = smov [#allocation8]   ;;  %s29_s23 = int_to_ptr.hbm [resolvable:$true] %s28_s23 }
   0x3   :  { %s30_s25 = sshll.u32 %s241_s24, 4  ;;  %s242_s26 = smov 128   ;;  %s31_s25 = int_to_ptr.vmem [resolvable:$true] %s30_s25 }
   0x4   :  { %s243_s27 = smov 8  }
   0x5   :  { %36 = dma.hbm_to_vmem [thread:$0]  %s29_s23, 128, %s31_s25, [#allocation9], %s242_s26, %s242_s26, %s243_s27  }
   0x6   :  { %237 = dma.done.wait [#allocation9], 2048  }
   0x7   :  { %238 = vsyncadd [#allocation9], 4294965248  ;;  %v59_v0 = vld [vmem:[#allocation8 + $0x78] sm:$0xff]  ;;  %v58_v1 = vld [vmem:[#allocation8 + $0x70] sm:$0xff]  ;;  %vm131_vm0 = vcmask 0   ;;  %v244_v17 = vmov -inf   ;;  %v80_v18 = vlaneseq  ;;  %p156_p0 = scmp.le.f32.partialorder %s325_s1, %s324_s0  ;;  %v158_v63 = vstv %s326_s2 }
   0x8   :  { %60 = vmatpush.xpose.msra.mxu0 %v59_v0  ;;  %v57_v2 = vld [vmem:[#allocation8 + $0x68] sm:$0xff]  ;;  %v56_v3 = vld [vmem:[#allocation8 + $0x60] sm:$0xff]  ;;  %v55_v4 = vld [vmem:[#allocation8 + $0x58] sm:$0xff]  ;;  %132 = vst.msk [vmem:[#allocation2] sm:$0x1] %vm131_vm0, %v244_v17  ;;  %vm89_vm2 = vcmask 1040384  }
   0x9   :  { %v54_v5 = vld [vmem:[#allocation8 + $0x50] sm:$0xff]  ;;  %v53_v6 = vld [vmem:[#allocation8 + $0x48] sm:$0xff]  ;;  %v52_v7 = vld [vmem:[#allocation8 + $0x40] sm:$0xff]  ;;  %v81_v19 = vand.u32 127, %v80_v18  ;;  %v245_v30 = vmov 4294967295   ;;  %v246_v50 = vmov 0  }
   0xa   :  { %v51_v8 = vld [vmem:[#allocation8 + $0x38] sm:$0xff]  ;;  %v50_v9 = vld [vmem:[#allocation8 + $0x30] sm:$0xff]  ;;  %v49_v10 = vld [vmem:[#allocation8 + $0x28] sm:$0xff]  ;;  %133 = vst.msk [vmem:[#allocation3] sm:$0x1] %vm131_vm0, %v245_v30  ;;  %s247_s10 = smov [#allocation11]  }
   0xb   :  { %v48_v11 = vld [vmem:[#allocation8 + $0x20] sm:$0xff]  ;;  %v47_v12 = vld [vmem:[#allocation8 + $0x18] sm:$0xff]  ;;  %v46_v13 = vld [vmem:[#allocation8 + $0x10] sm:$0xff]  ;;  %vm85_vm1 = vcmp.lt.s32.totalorder %v81_v19, 8  ;;  %134 = vst.msk [vmem:[#allocation4] sm:$0x1] %vm131_vm0, %v246_v50 }
   0xc   :  { %61 = vmatpush.xpose.msra.mxu0 %v58_v1  ;;  %v45_v14 = vld [vmem:[#allocation8 + $0x8] sm:$0xff]  ;;  %v44_v15 = vld [vmem:[#allocation8] sm:$0xff]  ;;  %v43_v16 = vld [vmem:[%s327_s3] sm:$0x1]  ;;  %s160_s9 = scalar_select %p156_p0, 1, 0 }
   0xd   :  { %v87_v23 = vld [vmem:[%s329_s5] sm:$0x1]  ;;  %s170_s11 = sshll.u32 %s247_s10, 4  ;;  %s172_s14 = sshll.u32 %s330_s6, 4  ;;  %s171_s11 = int_to_ptr.vmem [resolvable:$true] %s170_s11  ;;  %s173_s14 = int_to_ptr.hbm [resolvable:$true] %s172_s14 }
   0xe   :  { %v88_v24 = vsel %vm85_vm1, %v87_v23, 4294967295  ;;  %v161_v62 = vstv %s160_s9 }
   0xf   :  { %v135_v39 = vld [vmem:[#allocation2] sm:$0x1]  ;;  %vm162_vm12 = vcmp.eq.s32.totalorder %v161_v62, 1 }
  0x10   :  { %62 = vmatpush.xpose.msra.mxu0 %v57_v2 }
  0x11   :  { %v138_v40 = vld [vmem:[#allocation3] sm:$0x1] }
  0x12   :  { %v145_v42 = vld [vmem:[#allocation3] sm:$0x1]  ;;  %v148_v59 = vld [vmem:[#allocation4] sm:$0x1] }
  0x14   :  { %63 = vmatpush.xpose.msra.mxu0 %v56_v3 }
  0x18   :  { %64 = vmatpush.xpose.msra.mxu0 %v55_v4 }
  0x1c   :  { %65 = vmatpush.xpose.msra.mxu0 %v54_v5 }
  0x20   :  { %66 = vmatpush.xpose.msra.mxu0 %v53_v6 }
  0x24   :  { %67 = vmatpush.xpose.msra.mxu0 %v52_v7 }
  0x28   :  { %68 = vmatpush.xpose.msra.mxu0 %v51_v8 }
  0x2c   :  { %69 = vmatpush.xpose.msra.mxu0 %v50_v9 }
  0x30   :  { %70 = vmatpush.xpose.msra.mxu0 %v49_v10 }
  0x34   :  { %71 = vmatpush.xpose.msra.mxu0 %v48_v11 }
  0x38   :  { %72 = vmatpush.xpose.msra.mxu0 %v47_v12 }
  0x3c   :  { %73 = vmatpush.xpose.msra.mxu0 %v46_v13 }
  0x40   :  { %74 = vmatpush.xpose.msra.mxu0 %v45_v14 }
  0x44   :  { %75 = vmatpush.xpose.msra.mxu0 %v44_v15 }
  0x47   :  { %76 = vmatmul.f32.vlgmr.msra.gmra.mxu0 %v43_v16 }
  0xc4   :  { %v77_v20 = vpop.f32.mrf.mxu0 }
  0xc5   :  { %v86_v21 = vsel %vm85_vm1, %v77_v20, -inf }
  0xc6   :  { %v90_v22 = vsel %vm89_vm2, %v86_v21, -inf }
  0xc7   :  { %91 = vmax.xlane.f32.xlu0 %v90_v22 }
 0x13a   :  { %v92_v25 = vpop.xlane.xlu0 %91 }
 0x13b   :  { %vm93_vm3 = vcmp.eq.f32.partialorder %v86_v21, %v92_v25  ;;  %vm137_vm5 = vcmp.eq.f32.partialorder %v92_v25, %v135_v39  ;;  %vm136_vm8 = vcmp.gt.f32.partialorder %v92_v25, %v135_v39 }
 0x13c   :  { %v94_v26 = vsel %vm93_vm3, %v88_v24, 4294967295 }
 0x13d   :  { %v95_v27 = vsel %vm89_vm2, %v94_v26, 2147483648 }
 0x13e   :  { %v97_v28 = vshra.s32 %v95_v27, 16  ;;  %v96_v31 = vand.u32 65535, %v95_v27 }
 0x140   :  { %v99_v29 = vcvt.s32.f32 %v97_v28  ;;  %v98_v33 = vcvt.s32.f32 %v96_v31 }
 0x142   :  { %100 = vmax.xlane.f32.xlu0 %v99_v29 }
 0x1b5   :  { %v101_v32 = vpop.xlane.xlu0 %100 }
 0x1b6   :  { %vm102_vm4 = vcmp.eq.f32.partialorder %v99_v29, %v101_v32  ;;  %v107_v35 = vcvt.f32.s32 %v101_v32 }
 0x1b7   :  { %v103_v34 = vsel %vm102_vm4, %v98_v33, -inf }
 0x1b8   :  { %104 = vmax.xlane.f32.xlu1 %v103_v34  ;;  %v108_v37 = vshll.u32 %v107_v35, 16 }
 0x22b   :  { %v105_v36 = vpop.xlane.xlu1 %104 }
 0x22c   :  { %v106_v38 = vcvt.f32.s32 %v105_v36 }
 0x22e   :  { %v109_v41 = vadd.s32 %v108_v37, %v106_v38 }
 0x230   :  { %vm139_vm6 = vcmp.gt.s32.totalorder %v109_v41, %v138_v40  ;;  %vm110_vm7 = vcmp.eq.s32.totalorder %v94_v26, %v109_v41 }
 0x231   :  { %vm140_vm9 = vmand %vm137_vm5, %vm139_vm6  ;;  %v111_v43 = vsel %vm110_vm7, %v81_v19, 2147483647 }
 0x232   :  { %vm296_vm10 = vmor %vm136_vm8, %vm140_vm9  ;;  %v112_v45 = vsel %vm89_vm2, %v111_v43, 2147483647 }
 0x233   :  { %v142_v46 = vsel %vm296_vm10, %v92_v25, %v135_v39  ;;  %v146_v47 = vsel %vm296_vm10, %v109_v41, %v145_v42  ;;  %v114_v48 = vshra.s32 %v112_v45, 16  ;;  %v113_v51 = vand.u32 65535, %v112_v45 }
 0x234   :  { %144 = vst.msk [vmem:[#allocation2] sm:$0x1] %vm131_vm0, %v142_v46 }
 0x235   :  { %147 = vst.msk [vmem:[#allocation3] sm:$0x1] %vm131_vm0, %v146_v47  ;;  %v116_v49 = vcvt.s32.f32 %v114_v48  ;;  %v115_v53 = vcvt.s32.f32 %v113_v51 }
 0x237   :  { %117 = vmin.xlane.f32.xlu1 %v116_v49 }
 0x2aa   :  { %v118_v52 = vpop.xlane.xlu1 %117 }
 0x2ab   :  { %vm119_vm11 = vcmp.eq.f32.partialorder %v116_v49, %v118_v52  ;;  %v124_v55 = vcvt.f32.s32 %v118_v52 }
 0x2ac   :  { %v120_v54 = vsel %vm119_vm11, %v115_v53, inf }
 0x2ad   :  { %121 = vmin.xlane.f32.xlu2 %v120_v54  ;;  %v125_v57 = vshll.u32 %v124_v55, 16 }
 0x320   :  { %v122_v56 = vpop.xlane.xlu2 %121 }
 0x321   :  { %v123_v58 = vcvt.f32.s32 %v122_v56 }
 0x323   :  { %v126_v60 = vadd.s32 %v125_v57, %v123_v58 }
 0x325   :  { %v149_v61 = vsel %vm296_vm10, %v126_v60, %v148_v59 }
 0x326   :  { %150 = vst.msk [vmem:[#allocation4] sm:$0x1] %vm131_vm0, %v149_v61 }
 0x32d   :  { %v159_v0 = vld [vmem:[#allocation4] sm:$0x1] }
 0x32e   :  { %v163_v1 = vsel %vm162_vm12, %v158_v63, %v159_v0 }
 0x32f   :  { %164 = vst.msk [vmem:[#allocation11] sm:$0x1] %vm131_vm0, %v163_v1 }
 0x330   :  { %175 = dma.vmem_to_hbm [thread:$0]  %s171_s11, 16, %s173_s14, [#allocation10]  }
 0x331   :  { %239 = dma.done.wait [#allocation10], 16  }
 0x332   :  { %240 = vsyncadd [#allocation10], 4294967280 }
 0x333   :  { %180 = vsyncpa [#allocation9], 1 }
 0x334   :  { %181 = vsyncpa [#allocation10], 1 }

</bundles_post_ra>
